<compile_context>
chip_gen: v5e
topology: v5e:2x2
jax: 0.10.0
libtpu: 0.0.40
codegen_flags: <defaults>
</compile_context>

<pallas_src>
import jax
import jax.numpy as jnp
from jax.experimental import pallas as pl
from jax.experimental.pallas import tpu as pltpu

LANES = 128       # lane width of a vreg (last dim)
TM_MAX = 2048     # max rows per grid step (1 MiB f32 per block)


def _hybrid_activation_kernel(x_ref, o_ref):
    # out = sigmoid(x) * x, computed in f32 on the VPU/EUP, cast back to the
    # output dtype for the store.
    x = x_ref[...].astype(jnp.float32)
    o_ref[...] = (x * jax.nn.sigmoid(x)).astype(o_ref.dtype)


def hybrid_activation(x):
    """Pallas TPU implementation of HybridActivation.forward(x) = sigmoid(x)*x."""
    orig_shape = x.shape
    orig_dtype = x.dtype
    n = x.size

    # ---- Layout: flatten row-major to a lane-dense (rows, 128) slab. ----
    rows = -(-n // LANES)                       # ceil(n / 128)

    # Row tile: as large as possible up to TM_MAX, rounded to the packed
    # sublane tile for the input dtype (8 for f32, 16 for bf16, 32 for int8).
    sublane_mult = max(8, 32 // jnp.dtype(orig_dtype).itemsize)
    block_rows = -(-rows // sublane_mult) * sublane_mult
    block_rows = min(TM_MAX, block_rows)

    rows_padded = -(-rows // block_rows) * block_rows
    padded_n = rows_padded * LANES

    flat = x.reshape(-1)
    if padded_n != n:
        # Zero padding is semantically free: the pad region is sliced off
        # before returning (and silu(0) == 0 anyway).
        flat = jnp.pad(flat, (0, padded_n - n))
    x2d = flat.reshape(rows_padded, LANES)

    grid = (rows_padded // block_rows,)
    itemsize = jnp.dtype(orig_dtype).itemsize

    out2d = pl.pallas_call(
        _hybrid_activation_kernel,
        out_shape=jax.ShapeDtypeStruct((rows_padded, LANES), orig_dtype),
        grid_spec=pltpu.PrefetchScalarGridSpec(
            num_scalar_prefetch=0,
            grid=grid,
            in_specs=[pl.BlockSpec((block_rows, LANES), lambda i: (i, 0))],
            out_specs=pl.BlockSpec((block_rows, LANES), lambda i: (i, 0)),
        ),
        compiler_params=pltpu.CompilerParams(
            # Pure elementwise map: every grid step is independent, so the
            # axis is parallel (lets v7x shard rows across its 2 TensorCores;
            # harmless no-op on v5e/v6e).
            dimension_semantics=("parallel",),
        ),
        cost_estimate=pl.CostEstimate(
            flops=4 * padded_n,                 # mul + add + div-ish per elem
            transcendentals=padded_n,           # one exp per element
            bytes_accessed=2 * padded_n * itemsize,   # read x + write out
        ),
    )(x2d)

    return out2d.reshape(-1)[:n].reshape(orig_shape)


if __name__ == "__main__":
    key = jax.random.PRNGKey(0)
    # Small shape consistent with typical NCHW usage: batch=2, channels=4,
    # spatial=16x16.
    shape = (2, 4, 16, 16)
    x = jax.random.normal(key, shape, dtype=jnp.float32)

    y = hybrid_activation(x)
    y = jax.block_until_ready(y)

    # Reference check in plain JAX (same math as the PyTorch module).
    ref = jax.nn.sigmoid(x) * x
    assert y.shape == x.shape, (y.shape, x.shape)
    assert jnp.allclose(y, ref, rtol=1e-5, atol=1e-6), float(
        jnp.max(jnp.abs(y - ref))
    )

    print("KERNEL_OK")
</pallas_src>

<mosaic_0001>
module attributes {stable_mosaic.version = 11 : i64} {
  func.func @_hybrid_activation_kernel(%arg0: i32, %arg1: memref<16x128xf32, #tpu.memory_space<vmem>>, %arg2: memref<16x128xf32, #tpu.memory_space<vmem>>) attributes {dimension_semantics = [#tpu.dimension_semantics<parallel>], iteration_bounds = array<i64: 1>, scalar_prefetch = 0 : i64, scratch_operands = 0 : i64, tpu.core_type = #tpu.core_type<tc>, window_params = [{transform_indices = @transform_0, window_bounds = array<i64: 16, 128>}, {transform_indices = @transform_1, window_bounds = array<i64: 16, 128>}]} {
    %c0 = arith.constant 0 : index
    %c0_0 = arith.constant 0 : index
    %0 = vector.load %arg1[%c0, %c0_0] : memref<16x128xf32, #tpu.memory_space<vmem>>, vector<16x128xf32>
    %1 = arith.negf %0 : vector<16x128xf32>
    %2 = math.exp %1 : vector<16x128xf32>
    %cst = arith.constant 1.000000e+00 : f32
    %3 = vector.broadcast %cst : f32 to vector<16x128xf32>
    %4 = arith.addf %3, %2 : vector<16x128xf32>
    %5 = arith.divf %3, %4 : vector<16x128xf32>
    %6 = arith.mulf %0, %5 : vector<16x128xf32>
    %c0_1 = arith.constant 0 : index
    %c0_2 = arith.constant 0 : index
    %7 = vector.load %arg2[%c0_1, %c0_2] : memref<16x128xf32, #tpu.memory_space<vmem>>, vector<16x128xf32>
    tpu.vector_store %arg2[%c0_1, %c0_2], %6 {strides = array<i32>} : memref<16x128xf32, #tpu.memory_space<vmem>>, vector<16x128xf32>,
    return
  }
  func.func @transform_0(%arg0: i32) -> (i32, i32) {
    %c0_i32 = arith.constant 0 : i32
    %c0_i32_0 = arith.constant 0 : i32
    return %arg0, %c0_i32 : i32, i32
  }
  func.func @transform_1(%arg0: i32) -> (i32, i32) {
    %c0_i32 = arith.constant 0 : i32
    %c0_i32_0 = arith.constant 0 : i32
    return %arg0, %c0_i32 : i32, i32
  }
}

</mosaic_0001>

<bundles_post_ra>
// kernel: tpu_custom_call.1
= control target key start
LH: loop header
LB: loop body
LE: loop exit
PB: predicated region body
PF: predicated region fallthrough
CT: control target
= control target key end

     0   :  { %6 = vsyncpa [#allocation3], 0  ;;  %s180_s0 = inlined_call_operand.hbm [shape: f32[16,128], index: 0, kind: input, shape index: {}]   ;;  %s181_s1 = inlined_call_operand.hbm [shape: f32[16,128], index: 1, kind: output, shape index: {}]  }
   0x1   :  { %7 = vsyncpa [#allocation4], 0  ;;  %s12_s8 = sshll.u32 %s180_s0, 4  ;;  %s154_s9 = smov [#allocation2]   ;;  %s13_s8 = int_to_ptr.hbm [resolvable:$true] %s12_s8 }
   0x2   :  { %s14_s10 = sshll.u32 %s154_s9, 4  ;;  %s155_s11 = smov 128   ;;  %s15_s10 = int_to_ptr.vmem [resolvable:$true] %s14_s10 }
   0x3   :  { %s156_s12 = smov 8  }
   0x4   :  { %20 = dma.hbm_to_vmem [thread:$0]  %s13_s8, 256, %s15_s10, [#allocation3], %s155_s11, %s155_s11, %s156_s12  }
   0x5   :  { %150 = dma.done.wait [#allocation3], 256  }
   0x6   :  { %151 = vsyncadd [#allocation3], 4294967040  ;;  %v25_v0 = vld [vmem:[#allocation2] sm:$0xff]  ;;  %v26_v1 = vld [vmem:[#allocation2 + $0x8] sm:$0xff]  ;;  %s157_s0 = smov [#allocation5]   ;;  %s75_s16 = sshll.u32 %s181_s1, 4  ;;  %s76_s16 = int_to_ptr.hbm [resolvable:$true] %s75_s16 }
   0x7   :  { %v88_v2 = vmul.f32 -1.442695, %v25_v0  ;;  %v89_v3 = vmul.f32 -1.442695, %v26_v1  ;;  %s73_s13 = sshll.u32 %s157_s0, 4  ;;  %s74_s13 = int_to_ptr.vmem [resolvable:$true] %s73_s13 }
   0x9   :  { %94 = vpow2.f32 %v88_v2 }
   0xa   :  { %96 = vpow2.f32 %v89_v3 }
   0xf   :  { %v95_v4 = vpop.eup %94 }
  0x10   :  { %v97_v5 = vpop.eup %96  ;;  %v33_v6 = vadd.f32 1.0, %v95_v4 }
  0x11   :  { %v34_v7 = vadd.f32 1.0, %v97_v5 }
  0x12   :  { %98 = vrcp.f32 %v33_v6  ;;  %vm40_vm0 = vweird.f32 %v33_v6  ;;  %v46_v11 = vand.u32 2147483648, %v33_v6  ;;  %v44_v14 = vand.u32 2147483647, %v33_v6 }
  0x13   :  { %100 = vrcp.f32 %v34_v7  ;;  %v61_v15 = vand.u32 2147483648, %v34_v7  ;;  %vm55_vm2 = vweird.f32 %v34_v7  ;;  %v59_v17 = vand.u32 2147483647, %v34_v7 }
  0x14   :  { %v47_v19 = vor.u32 1.1754944e-38, %v46_v11  ;;  %vm45_vm5 = vcmp.eq.f32.partialorder %v44_v14, 8.507059e+37 }
  0x15   :  { %v62_v22 = vor.u32 1.1754944e-38, %v61_v15  ;;  %vm60_vm7 = vcmp.eq.f32.partialorder %v59_v17, 8.507059e+37 }
  0x18   :  { %v99_v8 = vpop.eup %98 }
  0x19   :  { %v101_v9 = vpop.eup %100  ;;  %v36_v10 = vmul.f32 %v99_v8, %v33_v6  ;;  %vm41_vm1 = vweird.f32 %v99_v8 }
  0x1a   :  { %v51_v12 = vmul.f32 %v101_v9, %v34_v7  ;;  %vm56_vm3 = vweird.f32 %v101_v9  ;;  %vm42_vm4 = vmor %vm40_vm0, %vm41_vm1 }
  0x1b   :  { %v37_v13 = vsub.f32 1.0, %v36_v10  ;;  %vm57_vm6 = vmor %vm55_vm2, %vm56_vm3 }
  0x1c   :  { %v52_v16 = vsub.f32 1.0, %v51_v12 }
  0x1d   :  { %v38_v18 = vmul.f32 %v99_v8, %v37_v13 }
  0x1e   :  { %v53_v20 = vmul.f32 %v101_v9, %v52_v16 }
  0x1f   :  { %v39_v21 = vadd.f32 %v99_v8, %v38_v18 }
  0x20   :  { %v54_v23 = vadd.f32 %v101_v9, %v53_v20 }
  0x21   :  { %v43_v24 = vsel %vm42_vm4, %v99_v8, %v39_v21 }
  0x22   :  { %v48_v25 = vsel %vm45_vm5, %v47_v19, %v43_v24  ;;  %v58_v26 = vsel %vm57_vm6, %v101_v9, %v54_v23 }
  0x23   :  { %v65_v27 = vmul.f32 %v48_v25, %v25_v0  ;;  %v63_v28 = vsel %vm60_vm7, %v62_v22, %v58_v26 }
  0x24   :  { %v66_v29 = vmul.f32 %v63_v28, %v26_v1 }
  0x25   :  { %67 = vst [vmem:[#allocation5] sm:$0xff] %v65_v27 }
  0x26   :  { %68 = vst [vmem:[#allocation5 + $0x8] sm:$0xff] %v66_v29 }
  0x27   :  { %81 = dma.vmem_to_hbm [thread:$0]  %s74_s13, 256, %s76_s16, [#allocation4], %s155_s11, %s155_s11, %s156_s12  }
  0x28   :  { %152 = dma.done.wait [#allocation4], 256  }
  0x29   :  { %153 = vsyncadd [#allocation4], 4294967040 }
  0x2a   :  { %86 = vsyncpa [#allocation3], 1 }
  0x2b   :  { %87 = vsyncpa [#allocation4], 1 }

</bundles_post_ra>
